<compile_context>
chip_gen: v6e
topology: v6e:2x2x1
jax: 0.10.0
libtpu: 0.0.40
codegen_flags: <defaults>
</compile_context>

<pallas_src>
import jax
import jax.numpy as jnp
from jax.experimental import pallas as pl
from jax.experimental.pallas import tpu as pltpu


def _round_up(x, m):
    return (x + m - 1) // m * m


def _vmem_cap_bytes():
    try:
        return int(pltpu.get_tpu_info().vmem_capacity_bytes)
    except Exception:
        return 64 * 1024 * 1024  # conservative fallback (v7x per-TC VMEM)


def _self_output_kernel(eps, h_dim):
    inv_h = 1.0 / float(h_dim)

    def kernel(h_ref, inp_ref, w_ref, p_ref, o_ref):
        # Dense on the MXU in the streamed dtype (bf16 in production), f32 accumulate.
        y = jnp.dot(h_ref[...], w_ref[...], preferred_element_type=jnp.float32)

        params = p_ref[...]                      # (3, H) f32: [bias; gamma; beta]
        bias = params[0:1, :]
        gamma = params[1:2, :]
        beta = params[2:3, :]

        # StableDropout is identity at inference time.
        # TODO(synk): training-mode XDropout (bernoulli mask + 1/(1-p) scale) not implemented.

        z = y + bias + inp_ref[...].astype(jnp.float32)

        # Two-pass LayerNorm stats in f32 (avoids E[z^2]-E[z]^2 cancellation when |mean|>>std).
        mean = jnp.sum(z, axis=-1, keepdims=True) * inv_h
        zc = z - mean
        var = jnp.sum(zc * zc, axis=-1, keepdims=True) * inv_h
        normed = zc * jax.lax.rsqrt(var + eps)

        o_ref[...] = (normed * gamma + beta).astype(o_ref.dtype)

    return kernel


def prepare_self_output_params(weight, bias, ln_gamma, ln_beta, *, matmul_dtype=jnp.bfloat16):
    """One-time (parameter-load-time) prep — keep this OFF the per-call forward path.

    weight: (H_out, H_in) torch nn.Linear layout.
    Returns:
      w_t    : (H_in, H_out) in `matmul_dtype` (pre-transposed so the kernel does x @ w_t)
      params : (3, H) float32 stack of [bias; ln_gamma; ln_beta]
    """
    w_t = jnp.asarray(weight).T.astype(matmul_dtype)
    params = jnp.stack(
        [jnp.asarray(bias, dtype=jnp.float32),
         jnp.asarray(ln_gamma, dtype=jnp.float32),
         jnp.asarray(ln_beta, dtype=jnp.float32)],
        axis=0)
    return w_t, params


def deberta_v2_self_output(hidden_states, input_tensor, w_t, params, *, eps=1e-7, tm=512):
    """hidden_states, input_tensor: (B, S, H).  w_t: (H, H) pre-transposed (in, out) weight.
    params: (3, H) f32 [bias; gamma; beta] from prepare_self_output_params().

    For best performance pass bf16 hidden_states / input_tensor and a bf16 w_t; the
    matmul accumulator and all LayerNorm math stay in f32 regardless.
    """
    B, S, H = hidden_states.shape
    assert input_tensor.shape == (B, S, H)
    assert w_t.shape == (H, H)
    assert params.shape == (3, H)
    n_tok = B * S
    out_dtype = hidden_states.dtype

    # Row tile: MXU-filling by default (512, a multiple of 256 for v6e/v7x MXUs and of
    # 128 for v5e).  Clamp so the 1-D parallel grid has >= 2 steps when tokens allow
    # (v7x megacore), never exceeds the sublane-rounded token count, and stays a
    # multiple of 16 (bf16 sublane packing).
    tm = int(tm)
    tm = min(tm, _round_up(-(-n_tok // 2), 256))   # >= 2 grid steps when possible
    tm = min(tm, _round_up(n_tok, 16))
    tm = max(16, (tm // 16) * 16)

    # No jnp.pad: Pallas handles the ragged last row-block (padded reads, masked writes).
    grid = (pl.cdiv(n_tok, tm),)

    h2d = hidden_states.reshape(n_tok, H)
    i2d = input_tensor.reshape(n_tok, H)
    if h2d.dtype != w_t.dtype:
        # Keep both MXU operands in the weight's dtype (bf16 recommended).  Pass
        # activations already in that dtype to avoid this extra cast pass.
        h2d = h2d.astype(w_t.dtype)

    act_sz = jnp.dtype(h2d.dtype).itemsize
    res_sz = jnp.dtype(i2d.dtype).itemsize
    out_sz = jnp.dtype(out_dtype).itemsize
    w_sz = jnp.dtype(w_t.dtype).itemsize
    # Double-buffered activation / residual / output streams + single-buffered weight
    # and (sublane-padded) params + in-kernel f32 temporaries (z, centered, normed).
    est = (2 * tm * H * (act_sz + res_sz + out_sz)
           + H * H * w_sz
           + 8 * H * 4
           + 3 * tm * H * 4)
    vmem_cap = _vmem_cap_bytes()
    vmem_limit = int(min(int(0.85 * vmem_cap), max(32 * 1024 * 1024, est * 13 // 10)))

    out = pl.pallas_call(
        _self_output_kernel(float(eps), H),
        out_shape=jax.ShapeDtypeStruct((n_tok, H), out_dtype),
        grid_spec=pltpu.PrefetchScalarGridSpec(
            num_scalar_prefetch=0,
            grid=grid,
            in_specs=[
                pl.BlockSpec((tm, H), lambda i: (i, 0)),      # hidden_states tile (streamed)
                pl.BlockSpec((tm, H), lambda i: (i, 0)),      # input_tensor tile (streamed)
                pl.BlockSpec((H, H), lambda i: (0, 0),
                             pipeline_mode=pl.Buffered(1)),   # grid-invariant weight
                pl.BlockSpec((3, H), lambda i: (0, 0),
                             pipeline_mode=pl.Buffered(1)),   # [bias; gamma; beta]
            ],
            out_specs=pl.BlockSpec((tm, H), lambda i: (i, 0)),
        ),
        compiler_params=pltpu.CompilerParams(
            dimension_semantics=("parallel",),
            vmem_limit_bytes=vmem_limit,
        ),
    )(h2d, i2d, w_t, params)

    return out.reshape(B, S, H)


def _reference(hidden_states, input_tensor, weight, bias, ln_gamma, ln_beta, eps=1e-7):
    y = jnp.einsum("bsh,oh->bso", hidden_states, weight) + bias
    z = y + input_tensor
    mean = jnp.mean(z, axis=-1, keepdims=True)
    var = jnp.mean((z - mean) ** 2, axis=-1, keepdims=True)
    return (z - mean) * jax.lax.rsqrt(var + eps) * ln_gamma + ln_beta


if __name__ == "__main__":
    eps = 1e-7
    key = jax.random.PRNGKey(0)
    k_h, k_i, k_w, k_b, k_g = jax.random.split(key, 5)

    # --- small f32 correctness check (B=2, S=8, H=32) ---
    B, S, H = 2, 8, 32
    hidden_states = jax.random.normal(k_h, (B, S, H), dtype=jnp.float32)
    input_tensor = jax.random.normal(k_i, (B, S, H), dtype=jnp.float32)
    weight = jax.random.normal(k_w, (H, H), dtype=jnp.float32) * 0.02   # (out, in)
    bias = jax.random.normal(k_b, (H,), dtype=jnp.float32) * 0.01
    ln_gamma = 1.0 + 0.1 * jax.random.normal(k_g, (H,), dtype=jnp.float32)
    ln_beta = jnp.zeros((H,), dtype=jnp.float32)

    w_t, params = prepare_self_output_params(weight, bias, ln_gamma, ln_beta,
                                             matmul_dtype=jnp.float32)
    out = deberta_v2_self_output(hidden_states, input_tensor, w_t, params, eps=eps)
    out = jax.block_until_ready(out)
    ref = _reference(hidden_states, input_tensor, weight, bias, ln_gamma, ln_beta, eps)
    assert out.shape == (B, S, H)
    assert jnp.allclose(out, ref, atol=1e-4, rtol=1e-4), "f32 mismatch vs reference"

    # --- bf16 fast-path check (production dtype: full-rate MXU, f32 accumulate) ---
    B2, S2, H2 = 2, 128, 128
    kk = jax.random.split(jax.random.PRNGKey(1), 5)
    h_bf = jax.random.normal(kk[0], (B2, S2, H2), dtype=jnp.float32).astype(jnp.bfloat16)
    i_bf = jax.random.normal(kk[1], (B2, S2, H2), dtype=jnp.float32).astype(jnp.bfloat16)
    w_f = jax.random.normal(kk[2], (H2, H2), dtype=jnp.float32) * 0.02
    b_f = jax.random.normal(kk[3], (H2,), dtype=jnp.float32) * 0.01
    g_f = 1.0 + 0.1 * jax.random.normal(kk[4], (H2,), dtype=jnp.float32)
    be_f = jnp.zeros((H2,), dtype=jnp.float32)

    w_t_bf, params_bf = prepare_self_output_params(w_f, b_f, g_f, be_f,
                                                   matmul_dtype=jnp.bfloat16)
    out_bf = deberta_v2_self_output(h_bf, i_bf, w_t_bf, params_bf, eps=eps)
    out_bf = jax.block_until_ready(out_bf)
    ref_bf = _reference(h_bf.astype(jnp.float32), i_bf.astype(jnp.float32),
                        w_t_bf.T.astype(jnp.float32), b_f, g_f, be_f, eps)
    assert out_bf.shape == (B2, S2, H2)
    assert out_bf.dtype == jnp.bfloat16
    assert jnp.allclose(out_bf.astype(jnp.float32), ref_bf, atol=5e-2, rtol=5e-2), \
        "bf16 mismatch vs f32 reference"

    # --- ragged token count (no jnp.pad path): B=3, S=100, H=128, tm=128 -> 3 grid steps ---
    B3, S3, H3 = 3, 100, 128
    kr = jax.random.split(jax.random.PRNGKey(2), 5)
    h_r = jax.random.normal(kr[0], (B3, S3, H3), dtype=jnp.float32)
    i_r = jax.random.normal(kr[1], (B3, S3, H3), dtype=jnp.float32)
    w_r = jax.random.normal(kr[2], (H3, H3), dtype=jnp.float32) * 0.02
    b_r = jax.random.normal(kr[3], (H3,), dtype=jnp.float32) * 0.01
    g_r = 1.0 + 0.1 * jax.random.normal(kr[4], (H3,), dtype=jnp.float32)
    be_r = jnp.zeros((H3,), dtype=jnp.float32)

    w_t_r, params_r = prepare_self_output_params(w_r, b_r, g_r, be_r,
                                                 matmul_dtype=jnp.float32)
    out_r = deberta_v2_self_output(h_r, i_r, w_t_r, params_r, eps=eps, tm=128)
    out_r = jax.block_until_ready(out_r)
    ref_r = _reference(h_r, i_r, w_r, b_r, g_r, be_r, eps)
    assert out_r.shape == (B3, S3, H3)
    assert jnp.allclose(out_r, ref_r, atol=1e-4, rtol=1e-4), "ragged-tail mismatch vs reference"

    print("KERNEL_OK")
</pallas_src>

<mosaic_0001>
module attributes {stable_mosaic.version = 11 : i64} {
  func.func @kernel(%arg0: i32, %arg1: memref<16x32xf32, #tpu.memory_space<vmem>>, %arg2: memref<16x32xf32, #tpu.memory_space<vmem>>, %arg3: memref<32x32xf32, #tpu.memory_space<vmem>>, %arg4: memref<3x32xf32, #tpu.memory_space<vmem>>, %arg5: memref<16x32xf32, #tpu.memory_space<vmem>>) attributes {dimension_semantics = [#tpu.dimension_semantics<parallel>], iteration_bounds = array<i64: 1>, scalar_prefetch = 0 : i64, scratch_operands = 0 : i64, tpu.core_type = #tpu.core_type<tc>, window_params = [{transform_indices = @transform_0, window_bounds = array<i64: 16, 32>}, {transform_indices = @transform_1, window_bounds = array<i64: 16, 32>}, {pipeline_mode = #tpu.pipeline_mode<synchronous>, transform_indices = @transform_2, window_bounds = array<i64: 32, 32>}, {pipeline_mode = #tpu.pipeline_mode<synchronous>, transform_indices = @transform_3, window_bounds = array<i64: 3, 32>}, {transform_indices = @transform_4, window_bounds = array<i64: 16, 32>}]} {
    %c0 = arith.constant 0 : index
    %c0_0 = arith.constant 0 : index
    %0 = vector.load %arg1[%c0, %c0_0] : memref<16x32xf32, #tpu.memory_space<vmem>>, vector<16x32xf32>
    %c0_1 = arith.constant 0 : index
    %c0_2 = arith.constant 0 : index
    %1 = vector.load %arg3[%c0_1, %c0_2] : memref<32x32xf32, #tpu.memory_space<vmem>>, vector<32x32xf32>
    %cst = arith.constant dense<0.000000e+00> : vector<16x32xf32>
    %2 = tpu.matmul %0, %1, %cst {dimension_numbers = #tpu.dot_dimension_numbers<[1], [0], [0], [1], [0, 0, 1, 1], [], []>} : vector<16x32xf32>, vector<32x32xf32>, vector<16x32xf32> -> vector<16x32xf32>
    %c0_3 = arith.constant 0 : index
    %c0_4 = arith.constant 0 : index
    %3 = vector.load %arg4[%c0_3, %c0_4] : memref<3x32xf32, #tpu.memory_space<vmem>>, vector<3x32xf32>
    %4 = vector.extract_strided_slice %3 {offsets = [0, 0], sizes = [1, 32], strides = [1, 1]} : vector<3x32xf32> to vector<1x32xf32>
    %5 = vector.extract_strided_slice %3 {offsets = [1, 0], sizes = [1, 32], strides = [1, 1]} : vector<3x32xf32> to vector<1x32xf32>
    %6 = vector.extract_strided_slice %3 {offsets = [2, 0], sizes = [1, 32], strides = [1, 1]} : vector<3x32xf32> to vector<1x32xf32>
    %7 = vector.broadcast %4 : vector<1x32xf32> to vector<16x32xf32>
    %8 = arith.addf %2, %7 : vector<16x32xf32>
    %c0_5 = arith.constant 0 : index
    %c0_6 = arith.constant 0 : index
    %9 = vector.load %arg2[%c0_5, %c0_6] : memref<16x32xf32, #tpu.memory_space<vmem>>, vector<16x32xf32>
    %10 = arith.addf %8, %9 : vector<16x32xf32>
    %cst_7 = arith.constant dense<0.000000e+00> : vector<16xf32>
    %11 = vector.multi_reduction <add>, %10, %cst_7 [1] : vector<16x32xf32> to vector<16xf32>
    %12 = vector.shape_cast %11 : vector<16xf32> to vector<16x1xf32>
    %cst_8 = arith.constant 3.125000e-02 : f32
    %13 = vector.broadcast %cst_8 : f32 to vector<16x1xf32>
    %14 = arith.mulf %12, %13 : vector<16x1xf32>
    %15 = vector.broadcast %14 : vector<16x1xf32> to vector<16x32xf32>
    %16 = arith.subf %10, %15 : vector<16x32xf32>
    %17 = arith.mulf %16, %16 : vector<16x32xf32>
    %cst_9 = arith.constant dense<0.000000e+00> : vector<16xf32>
    %18 = vector.multi_reduction <add>, %17, %cst_9 [1] : vector<16x32xf32> to vector<16xf32>
    %19 = vector.shape_cast %18 : vector<16xf32> to vector<16x1xf32>
    %cst_10 = arith.constant 3.125000e-02 : f32
    %20 = vector.broadcast %cst_10 : f32 to vector<16x1xf32>
    %21 = arith.mulf %19, %20 : vector<16x1xf32>
    %cst_11 = arith.constant 1.000000e-07 : f32
    %22 = vector.broadcast %cst_11 : f32 to vector<16x1xf32>
    %23 = arith.addf %21, %22 : vector<16x1xf32>
    %24 = math.rsqrt %23 : vector<16x1xf32>
    %25 = vector.broadcast %24 : vector<16x1xf32> to vector<16x32xf32>
    %26 = arith.mulf %16, %25 : vector<16x32xf32>
    %27 = vector.broadcast %5 : vector<1x32xf32> to vector<16x32xf32>
    %28 = arith.mulf %26, %27 : vector<16x32xf32>
    %29 = vector.broadcast %6 : vector<1x32xf32> to vector<16x32xf32>
    %30 = arith.addf %28, %29 : vector<16x32xf32>
    %c0_12 = arith.constant 0 : index
    %c0_13 = arith.constant 0 : index
    %31 = vector.load %arg5[%c0_12, %c0_13] : memref<16x32xf32, #tpu.memory_space<vmem>>, vector<16x32xf32>
    tpu.vector_store %arg5[%c0_12, %c0_13], %30 {strides = array<i32>} : memref<16x32xf32, #tpu.memory_space<vmem>>, vector<16x32xf32>,
    return
  }
  func.func @transform_0(%arg0: i32) -> (i32, i32) {
    %c0_i32 = arith.constant 0 : i32
    %c0_i32_0 = arith.constant 0 : i32
    return %arg0, %c0_i32 : i32, i32
  }
  func.func @transform_1(%arg0: i32) -> (i32, i32) {
    %c0_i32 = arith.constant 0 : i32
    %c0_i32_0 = arith.constant 0 : i32
    return %arg0, %c0_i32 : i32, i32
  }
  func.func @transform_2(%arg0: i32) -> (i32, i32) {
    %c0_i32 = arith.constant 0 : i32
    %c0_i32_0 = arith.constant 0 : i32
    %c0_i32_1 = arith.constant 0 : i32
    return %c0_i32, %c0_i32_0 : i32, i32
  }
  func.func @transform_3(%arg0: i32) -> (i32, i32) {
    %c0_i32 = arith.constant 0 : i32
    %c0_i32_0 = arith.constant 0 : i32
    %c0_i32_1 = arith.constant 0 : i32
    return %c0_i32, %c0_i32_0 : i32, i32
  }
  func.func @transform_4(%arg0: i32) -> (i32, i32) {
    %c0_i32 = arith.constant 0 : i32
    %c0_i32_0 = arith.constant 0 : i32
    return %arg0, %c0_i32 : i32, i32
  }
}

</mosaic_0001>

<bundles_post_ra>
// kernel: tpu_custom_call.1
= control target key start
LH: loop header
LB: loop body
LE: loop exit
PB: predicated region body
PF: predicated region fallthrough
CT: control target
= control target key end

     0   :  { %9 = vsyncpa [#allocation3], 0  ;;  %s395_s0 = inlined_call_operand.hbm [shape: f32[16,32], index: 0, kind: input, shape index: {}]   ;;  %s396_s1 = inlined_call_operand.hbm [shape: f32[16,32], index: 1, kind: input, shape index: {}]   ;;  %s397_s2 = inlined_call_operand.hbm [shape: f32[32,32], index: 2, kind: input, shape index: {}]   ;;  %s398_s3 = inlined_call_operand.vmem [shape: f32[3,32], index: 3, kind: input, shape index: {}]   ;;  %s399_s4 = inlined_call_operand.hbm [shape: f32[16,32], index: 4, kind: output, shape index: {}]  }
   0x1   :  { %10 = vsyncpa [#allocation6], 0 }
   0x2   :  { %11 = vsyncpa [#allocation4], 0  ;;  %s329_s15 = smov [#allocation5]   ;;  %s330_s17 = smov [#allocation2]  }
   0x3   :  { %s29_s16 = sshll.u32 %s329_s15, 4  ;;  %s17_s18 = sshll.u32 %s330_s17, 4  ;;  %s30_s16 = int_to_ptr.vmem [resolvable:$true] %s29_s16  ;;  %s18_s18 = int_to_ptr.vmem [resolvable:$true] %s17_s18 }
   0x4   :  { %s251_s19 = scalar_lea.vmem %s30_s16, 256  ;;  %p256_p1 = scmp.lt.s32.totalorder %s30_s16, %s30_s16 }
   0x5   :  { %p252_p0 = scmp.ne.s32.totalorder %s30_s16, %s251_s19  ;;  %p257_p2 = scmp.lt.s32.totalorder %s251_s19, %s251_s19 }
   0x7   :  { %p258_p3 = por %p257_p2, %p256_p1 }
   0x9   :  { %p259_p4 = pnand %p258_p3, %p252_p0 }
   0xb   :  { %262 = shalt.err (!%p259_p4)
}
   0xc   :  { %s331_s20 = smov 128   ;;  %s332_s21 = smov 8  }
   0xd   :  { %35 = dma.hbm_to_vmem [thread:$0]  %s396_s1, 256, %s30_s16, [#allocation6], %s331_s20, %s331_s20, %s332_s21  }
   0xe   :  { %s271_s24 = scalar_lea.vmem %s18_s18, 256  ;;  %p276_p6 = scmp.lt.s32.totalorder %s18_s18, %s18_s18 }
   0xf   :  { %p272_p5 = scmp.ne.s32.totalorder %s18_s18, %s271_s24  ;;  %p277_p7 = scmp.lt.s32.totalorder %s271_s24, %s271_s24 }
  0x11   :  { %p278_p8 = por %p277_p7, %p276_p6 }
  0x13   :  { %p279_p9 = pnand %p278_p8, %p272_p5 }
  0x15   :  { %282 = shalt.err (!%p279_p9)
}
  0x16   :  { %23 = dma.hbm_to_vmem [thread:$0]  %s395_s0, 256, %s18_s18, [#allocation3], %s331_s20, %s331_s20, %s332_s21  }
  0x17   :  { %s333_s27 = smov [#allocation7]  }
  0x18   :  { %s41_s28 = sshll.u32 %s333_s27, 4  ;;  %s42_s28 = int_to_ptr.vmem [resolvable:$true] %s41_s28 }
  0x19   :  { %s291_s29 = scalar_lea.vmem %s42_s28, 512  ;;  %p296_p11 = scmp.lt.s32.totalorder %s42_s28, %s42_s28 }
  0x1a   :  { %p292_p10 = scmp.ne.s32.totalorder %s42_s28, %s291_s29  ;;  %p297_p12 = scmp.lt.s32.totalorder %s291_s29, %s291_s29 }
  0x1c   :  { %p298_p13 = por %p297_p12, %p296_p11 }
  0x1e   :  { %p299_p0 = pnand %p298_p13, %p292_p10 }
  0x20   :  { %302 = shalt.err (!%p299_p0)
}
  0x21   :  { %47 = dma.hbm_to_vmem [thread:$0]  %s397_s2, 512, %s42_s28, [#allocation6], %s331_s20, %s331_s20, %s332_s21  }
  0x22   :  { %323 = dma.done.wait [#allocation3], 256  }
  0x23   :  { %324 = vsyncadd [#allocation3], 4294967040 }
  0x24   :  { %325 = dma.done.wait [#allocation6], 768  }
  0x25   :  { %326 = vsyncadd [#allocation6], 4294966528  ;;  %vm70_vm0 = vcmask 261120   ;;  %v64_v0 = vld [vmem:[#allocation7 + $0x18] sm:$0xff]  ;;  %v63_v1 = vld [vmem:[#allocation7 + $0x10] sm:$0xff]  ;;  %v66_v6 = vlaneseq }
  0x26   :  { %222 = vmatprep.subr.mxu0 %v64_v0  ;;  %v59_v2 = vld [vmem:[#allocation2] sm:$0xff]  ;;  %v62_v3 = vld [vmem:[#allocation7 + $0x8] sm:$0xff]  ;;  %v152_v13 = vld [vmem:[#allocation5] sm:$0xff] }
  0x27   :  { %223 = vmatpush3.msra.mxu0 %v64_v0  ;;  %230 = vmatprep.mubr.msk.f32.mxu0 %vm70_vm0, %v59_v2  ;;  %v61_v4 = vld [vmem:[#allocation7] sm:$0xff]  ;;  %v60_v5 = vld [vmem:[#allocation2 + $0x8] sm:$0xff]  ;;  %v67_v7 = vshrl.u32 %v66_v6, 7  ;;  %v153_v16 = vld [vmem:[#allocation5 + $0x8] sm:$0xff] }
  0x28   :  { %224 = vmatprep.subr.mxu0 %v63_v1  ;;  %v65_v9 = vld [vmem:[%s398_s3] sm:$0x7]  ;;  %s334_s3 = smov [#allocation8]  }
  0x29   :  { %225 = vmatpush3.msra.mxu0 %v63_v1  ;;  %v68_v8 = vsub.s32 0, %v67_v7  ;;  %v184_v37 = vsub.s32 1, %v67_v7  ;;  %v190_v38 = vsub.s32 2, %v67_v7  ;;  %s201_s5 = sshll.u32 %s334_s3, 4  ;;  %s202_s5 = int_to_ptr.vmem [resolvable:$true] %s201_s5 }
  0x2a   :  { %226 = vmatprep.subr.mxu0 %v62_v3  ;;  %s303_s6 = scalar_lea.vmem %s202_s5, 256  ;;  %p308_p2 = scmp.lt.s32.totalorder %s202_s5, %s202_s5 }
  0x2b   :  { %227 = vmatpush3.msra.mxu0 %v62_v3  ;;  %v69_v10 = vrot.slane %v65_v9, %v68_v8  ;;  %v185_v39 = vrot.slane %v65_v9, %v184_v37  ;;  %v191_v41 = vrot.slane %v65_v9, %v190_v38  ;;  %p304_p1 = scmp.ne.s32.totalorder %s202_s5, %s303_s6  ;;  %p309_p3 = scmp.lt.s32.totalorder %s303_s6, %s303_s6 }
  0x2c   :  { %228 = vmatprep.subr.mxu0 %v61_v4 }
  0x2d   :  { %229 = vmatpush3.msra.mxu0 %v61_v4  ;;  %p310_p4 = por %p309_p3, %p308_p2 }
  0x2e   :  { %231 = vmatmul.mubr.msk.f32.vlgmr.msra.gmra.mxu0 %vm70_vm0, %v60_v5 }
  0x2f   :  { %p311_p5 = pnand %p310_p4, %p304_p1 }
  0xee   :  { %v232_v11 = vpop.f32.mrf.mxu0 }
  0xef   :  { %v149_v14 = vadd.f32 %v232_v11, %v69_v10 }
  0xf0   :  { %v143_v12 = vpop.f32.mrf.mxu0 }
  0xf1   :  { %v144_v15 = vadd.f32 %v143_v12, %v69_v10  ;;  %v155_v19 = vadd.f32 %v153_v16, %v149_v14 }
  0xf3   :  { %v154_v17 = vadd.f32 %v152_v13, %v144_v15  ;;  %v159_v20 = vsel %vm70_vm0, %v155_v19, 0.0 }
  0xf5   :  { %v156_v18 = vsel %vm70_vm0, %v154_v17, 0.0 }
  0xf6   :  { %157 = vadd.xlane.f32.xlu0 %v156_v18 }
  0xfa   :  { %160 = vadd.xlane.f32.xlu0 %v159_v20 }
 0x17f   :  { %v158_v21 = vpop.xlane.xlu0 %157 }
 0x180   :  { %v162_v22 = vmul.f32 0.03125, %v158_v21 }
 0x182   :  { %v164_v23 = vsub.f32 %v154_v17, %v162_v22 }
 0x183   :  { %v161_v24 = vpop.xlane.xlu0 %160 }
 0x184   :  { %v163_v25 = vmul.f32 0.03125, %v161_v24  ;;  %v166_v26 = vmul.f32 %v164_v23, %v164_v23 }
 0x186   :  { %v165_v27 = vsub.f32 %v155_v19, %v163_v25  ;;  %v168_v28 = vsel %vm70_vm0, %v166_v26, 0.0 }
 0x187   :  { %169 = vadd.xlane.f32.xlu1 %v168_v28 }
 0x188   :  { %v167_v29 = vmul.f32 %v165_v27, %v165_v27 }
 0x18a   :  { %v171_v30 = vsel %vm70_vm0, %v167_v29, 0.0 }
 0x18b   :  { %172 = vadd.xlane.f32.xlu1 %v171_v30 }
 0x210   :  { %v170_v31 = vpop.xlane.xlu1 %169 }
 0x211   :  { %v174_v32 = vmul.f32 0.03125, %v170_v31 }
 0x213   :  { %v176_v33 = vadd.f32 1e-07, %v174_v32 }
 0x214   :  { %v173_v34 = vpop.xlane.xlu1 %172 }
 0x215   :  { %239 = vrsqrt.f32 %v176_v33  ;;  %v175_v35 = vmul.f32 0.03125, %v173_v34 }
 0x217   :  { %v177_v36 = vadd.f32 1e-07, %v175_v35 }
 0x219   :  { %241 = vrsqrt.f32 %v177_v36 }
 0x222   :  { %v240_v40 = vpop.eup %239 }
 0x223   :  { %v180_v42 = vmul.f32 %v240_v40, %v164_v23 }
 0x225   :  { %v186_v43 = vmul.f32 %v185_v39, %v180_v42 }
 0x226   :  { %v242_v44 = vpop.eup %241 }
 0x227   :  { %v181_v45 = vmul.f32 %v242_v44, %v165_v27  ;;  %v192_v46 = vadd.f32 %v191_v41, %v186_v43 }
 0x229   :  { %v187_v47 = vmul.f32 %v185_v39, %v181_v45  ;;  %194 = vst.msk [vmem:[#allocation8] sm:$0xff] %vm70_vm0, %v192_v46 }
 0x22b   :  { %v193_v48 = vadd.f32 %v191_v41, %v187_v47 }
 0x22d   :  { %195 = vst.msk [vmem:[#allocation8 + $0x8] sm:$0xff] %vm70_vm0, %v193_v48 }
 0x22e   :  { %314 = shalt.err (!%p311_p5)
}
 0x22f   :  { %207 = dma.vmem_to_hbm [thread:$0]  %s202_s5, 256, %s399_s4, [#allocation4], %s331_s20, %s331_s20, %s332_s21  }
 0x230   :  { %327 = dma.done.wait [#allocation4], 256  }
 0x231   :  { %328 = vsyncadd [#allocation4], 4294967040 }
 0x232   :  { %211 = vsyncpa [#allocation3], 1 }
 0x233   :  { %212 = vsyncpa [#allocation6], 1 }
 0x234   :  { %213 = vsyncpa [#allocation4], 1 }

</bundles_post_ra>
